<compile_context>
chip_gen: v7x
topology: tpu7x:2x2x1
jax: 0.10.0
libtpu: 0.0.40
codegen_flags: <defaults>
</compile_context>

<pallas_src>
import functools

import jax
import jax.numpy as jnp
import numpy as np
from jax.experimental import pallas as pl
from jax.experimental.pallas import tpu as pltpu

_CHUNK = 128          # one vreg-width of columns per fused-reduction step
_NEG = -1.0e30        # finite "minus infinity" (avoids inf-inf NaN corners)


def _round_up(x, m):
    return -(-x // m) * m


def _lse_kernel(m_total, mask_cols, nce_ref, sims_ref, out_ref, m_ref, rs_ref):
    """Row-wise log-sum-exp(sims * (1/nce)), accumulated over column tiles.

    nce_ref : SMEM (1,) f32            -- temperature
    sims_ref: VMEM (TM, TK)            -- similarity tile (any float dtype)
    out_ref : VMEM (TM, 1) f32         -- per-row LSE (written at last column step)
    m_ref   : VMEM (TM, 1) f32 scratch -- running row max
    rs_ref  : VMEM (TM, 1) f32 scratch -- running sum of exp(s - m)
    """
    k = pl.program_id(1)

    @pl.when(k == 0)
    def _():
        m_ref[...] = jnp.full_like(m_ref, _NEG)
        rs_ref[...] = jnp.zeros_like(rs_ref)

    inv_nce = 1.0 / nce_ref[0]                    # scalar, hoisted
    tm, tk = sims_ref.shape                       # static tile dims
    col0 = k * tk                                 # first global column of tile

    m = m_ref[...]
    rs = rs_ref[...]
    # Single fused pass: max + exp-sum accumulated chunk by chunk.  Static
    # 128-wide slices keep each chunk in vregs -- no (TM, TK) f32 temps.
    for c in range(tk // _CHUNK):
        off = c * _CHUNK
        s = sims_ref[:, off:off + _CHUNK].astype(jnp.float32) * inv_nce
        if mask_cols:                             # static flag: only if M was padded
            col = jax.lax.broadcasted_iota(jnp.int32, (tm, _CHUNK), 1) + (col0 + off)
            s = jnp.where(col < m_total, s, _NEG)  # padded cols -> exp() == 0
        m_new = jnp.maximum(m, jnp.max(s, axis=1, keepdims=True))
        rs = rs * jnp.exp(m - m_new) + jnp.sum(jnp.exp(s - m_new), axis=1,
                                               keepdims=True)
        m = m_new
    m_ref[...] = m
    rs_ref[...] = rs

    @pl.when(k == pl.num_programs(1) - 1)
    def _():
        out_ref[...] = m_ref[...] + jnp.log(rs_ref[...])


def infonce_pallas(sims, labels, nce, *, tile_rows=256, tile_cols=2048):
    """sims, labels: [N, M]; labels one-hot (exactly one positive per row);
    nce: scalar temperature.  Returns the scalar InfoNCE loss (f32)."""
    N, M = sims.shape
    nce_arr = jnp.asarray(nce, dtype=jnp.float32).reshape(1)

    # --- row tiling ---------------------------------------------------------
    sub = 16 if jnp.dtype(sims.dtype).itemsize < 4 else 8   # sublane granule
    n_sub = _round_up(N, sub)
    tm = min(tile_rows, n_sub)
    if n_sub >= 2 * sub:                 # ensure >= 2 parallel row tiles (v7x 2 TCs)
        tm = min(tm, _round_up((N + 1) // 2, sub))
    tm = max(sub, (tm // sub) * sub)
    n_pad = _round_up(N, tm)

    # --- column tiling: TK = largest multiple-of-128 divisor of padded M ----
    m_pad = _round_up(M, _CHUNK)
    q = m_pad // _CHUNK
    t_max = max(1, min(tile_cols // _CHUNK, q))
    t = next(d for d in range(t_max, 0, -1) if q % d == 0)
    tk = t * _CHUNK

    x = sims
    if n_pad != N or m_pad != M:
        # Padded rows give a finite LSE (sliced off below); padded columns are
        # masked inside the kernel.
        x = jnp.pad(x, ((0, n_pad - N), (0, m_pad - M)))

    kernel = functools.partial(_lse_kernel, M, m_pad != M)

    lse = pl.pallas_call(
        kernel,
        out_shape=jax.ShapeDtypeStruct((n_pad, 1), jnp.float32),
        grid=(n_pad // tm, m_pad // tk),
        in_specs=[
            pl.BlockSpec(memory_space=pltpu.MemorySpace.SMEM),   # nce scalar
            pl.BlockSpec((tm, tk), lambda i, k: (i, k)),         # sims tile
        ],
        out_specs=pl.BlockSpec((tm, 1), lambda i, k: (i, 0)),    # per-row LSE
        scratch_shapes=[pltpu.VMEM((tm, 1), jnp.float32),        # running max
                        pltpu.VMEM((tm, 1), jnp.float32)],       # running exp-sum
        compiler_params=pltpu.CompilerParams(
            dimension_semantics=("parallel", "arbitrary"),
            vmem_limit_bytes=32 << 20),
    )(nce_arr, x)

    # Positive logit per row: tiny gather in plain JAX (N elements) instead of
    # streaming a dense one-hot mask / full-width iota through the kernel.
    # TODO(synk): assumes exactly one positive per row (argmax of one-hot).
    pos_idx = jnp.argmax(labels, axis=-1).astype(jnp.int32)
    s_pos = jnp.take_along_axis(sims, pos_idx[:, None], axis=1)[:, 0]
    s_pos = s_pos.astype(jnp.float32) * (1.0 / nce_arr[0])

    # loss_i = -log(exp(s_pos_i) / sum_j exp(s_ij)) = lse_i - s_pos_i
    return jnp.mean(lse[:N, 0] - s_pos)


def infonce_ref(sims, labels, nce):
    """Plain-JAX reference mirroring the PyTorch module (one positive per row)."""
    new_sim = jnp.exp(sims.astype(jnp.float32) / nce)
    pos = jnp.sum(jnp.where(labels == 1.0, new_sim, 0.0), axis=1)
    return jnp.mean(-jnp.log(pos / new_sim.sum(1)))


if __name__ == "__main__":
    key = jax.random.PRNGKey(0)
    k_sims, k_lab = jax.random.split(key)

    N, M = 16, 128          # 16 anchors, 128 candidates each
    nce = 0.07              # temperature

    # cosine-similarity-like inputs (the usual InfoNCE regime)
    sims = jax.random.uniform(k_sims, (N, M), minval=-1.0, maxval=1.0,
                              dtype=jnp.float32)
    pos_idx = jax.random.randint(k_lab, (N,), 0, M)
    labels = jax.nn.one_hot(pos_idx, M, dtype=jnp.float32)   # one positive per row

    loss = infonce_pallas(sims, labels, nce)
    loss = jax.block_until_ready(loss)

    ref = infonce_ref(sims, labels, nce)
    np.testing.assert_allclose(np.asarray(loss), np.asarray(ref),
                               rtol=1e-5, atol=1e-5)

    print("KERNEL_OK")
</pallas_src>

<mosaic_0001>
module attributes {stable_mosaic.version = 11 : i64} {
  func.func @_lse_kernel(%arg0: i32, %arg1: i32, %arg2: memref<1xf32, #tpu.memory_space<smem>>, %arg3: memref<8x128xf32, #tpu.memory_space<vmem>>, %arg4: memref<8x1xf32, #tpu.memory_space<vmem>>, %arg5: memref<8x1xf32, #tpu.memory_space<vmem>>, %arg6: memref<8x1xf32, #tpu.memory_space<vmem>>) attributes {dimension_semantics = [#tpu.dimension_semantics<parallel>, #tpu.dimension_semantics<arbitrary>], iteration_bounds = array<i64: 2, 1>, scalar_prefetch = 0 : i64, scratch_operands = 2 : i64, tpu.core_type = #tpu.core_type<tc>, window_params = [{transform_indices = @transform_0, window_bounds = array<i64: 1>}, {transform_indices = @transform_1, window_bounds = array<i64: 8, 128>}, {transform_indices = @transform_2, window_bounds = array<i64: 8, 1>}]} {
    %c0_i32 = arith.constant 0 : i32
    %0 = arith.cmpi eq, %arg1, %c0_i32 : i32
    %1 = arith.extui %0 : i1 to i32
    %c0_i32_0 = arith.constant 0 : i32
    %2 = arith.cmpi ne, %1, %c0_i32_0 : i32
    scf.if %2 {
      %cst_15 = arith.constant -1.000000e+30 : f32
      %27 = vector.broadcast %cst_15 : f32 to vector<8x1xf32>
      %c0_16 = arith.constant 0 : index
      %c0_17 = arith.constant 0 : index
      %28 = vector.load %arg5[%c0_16, %c0_17] : memref<8x1xf32, #tpu.memory_space<vmem>>, vector<8x1xf32>
      tpu.vector_store %arg5[%c0_16, %c0_17], %27 {strides = array<i32>} : memref<8x1xf32, #tpu.memory_space<vmem>>, vector<8x1xf32>,
      %cst_18 = arith.constant 0.000000e+00 : f32
      %29 = vector.broadcast %cst_18 : f32 to vector<8x1xf32>
      %c0_19 = arith.constant 0 : index
      %c0_20 = arith.constant 0 : index
      %30 = vector.load %arg6[%c0_19, %c0_20] : memref<8x1xf32, #tpu.memory_space<vmem>>, vector<8x1xf32>
      tpu.vector_store %arg6[%c0_19, %c0_20], %29 {strides = array<i32>} : memref<8x1xf32, #tpu.memory_space<vmem>>, vector<8x1xf32>,
    } else {
    }
    %c0 = arith.constant 0 : index
    %3 = memref.load %arg2[%c0] : memref<1xf32, #tpu.memory_space<smem>>
    %cst = arith.constant 1.000000e+00 : f32
    %4 = arith.divf %cst, %3 : f32
    %c0_1 = arith.constant 0 : index
    %c0_2 = arith.constant 0 : index
    %5 = vector.load %arg5[%c0_1, %c0_2] : memref<8x1xf32, #tpu.memory_space<vmem>>, vector<8x1xf32>
    %c0_3 = arith.constant 0 : index
    %c0_4 = arith.constant 0 : index
    %6 = vector.load %arg6[%c0_3, %c0_4] : memref<8x1xf32, #tpu.memory_space<vmem>>, vector<8x1xf32>
    %c0_5 = arith.constant 0 : index
    %c0_6 = arith.constant 0 : index
    %7 = vector.load %arg3[%c0_5, %c0_6] : memref<8x128xf32, #tpu.memory_space<vmem>>, vector<8x128xf32>
    %8 = vector.broadcast %4 : f32 to vector<8x128xf32>
    %9 = arith.mulf %7, %8 : vector<8x128xf32>
    %cst_7 = arith.constant dense<0xFF800000> : vector<8xf32>
    %10 = vector.multi_reduction <maximumf>, %9, %cst_7 [1] : vector<8x128xf32> to vector<8xf32>
    %11 = vector.shape_cast %10 : vector<8xf32> to vector<8x1xf32>
    %12 = arith.maximumf %5, %11 : vector<8x1xf32>
    %13 = arith.subf %5, %12 : vector<8x1xf32>
    %14 = math.exp %13 : vector<8x1xf32>
    %15 = arith.mulf %6, %14 : vector<8x1xf32>
    %16 = vector.broadcast %12 : vector<8x1xf32> to vector<8x128xf32>
    %17 = arith.subf %9, %16 : vector<8x128xf32>
    %18 = math.exp %17 : vector<8x128xf32>
    %cst_8 = arith.constant dense<0.000000e+00> : vector<8xf32>
    %19 = vector.multi_reduction <add>, %18, %cst_8 [1] : vector<8x128xf32> to vector<8xf32>
    %20 = vector.shape_cast %19 : vector<8xf32> to vector<8x1xf32>
    %21 = arith.addf %15, %20 : vector<8x1xf32>
    %c0_9 = arith.constant 0 : index
    %c0_10 = arith.constant 0 : index
    %22 = vector.load %arg5[%c0_9, %c0_10] : memref<8x1xf32, #tpu.memory_space<vmem>>, vector<8x1xf32>
    tpu.vector_store %arg5[%c0_9, %c0_10], %12 {strides = array<i32>} : memref<8x1xf32, #tpu.memory_space<vmem>>, vector<8x1xf32>,
    %c0_11 = arith.constant 0 : index
    %c0_12 = arith.constant 0 : index
    %23 = vector.load %arg6[%c0_11, %c0_12] : memref<8x1xf32, #tpu.memory_space<vmem>>, vector<8x1xf32>
    tpu.vector_store %arg6[%c0_11, %c0_12], %21 {strides = array<i32>} : memref<8x1xf32, #tpu.memory_space<vmem>>, vector<8x1xf32>,
    %c0_i32_13 = arith.constant 0 : i32
    %24 = arith.cmpi eq, %arg1, %c0_i32_13 : i32
    %25 = arith.extui %24 : i1 to i32
    %c0_i32_14 = arith.constant 0 : i32
    %26 = arith.cmpi ne, %25, %c0_i32_14 : i32
    scf.if %26 {
      %c0_15 = arith.constant 0 : index
      %c0_16 = arith.constant 0 : index
      %27 = vector.load %arg5[%c0_15, %c0_16] : memref<8x1xf32, #tpu.memory_space<vmem>>, vector<8x1xf32>
      %c0_17 = arith.constant 0 : index
      %c0_18 = arith.constant 0 : index
      %28 = vector.load %arg6[%c0_17, %c0_18] : memref<8x1xf32, #tpu.memory_space<vmem>>, vector<8x1xf32>
      %29 = math.log %28 : vector<8x1xf32>
      %30 = arith.addf %27, %29 : vector<8x1xf32>
      %c0_19 = arith.constant 0 : index
      %c0_20 = arith.constant 0 : index
      %31 = vector.load %arg4[%c0_19, %c0_20] : memref<8x1xf32, #tpu.memory_space<vmem>>, vector<8x1xf32>
      tpu.vector_store %arg4[%c0_19, %c0_20], %30 {strides = array<i32>} : memref<8x1xf32, #tpu.memory_space<vmem>>, vector<8x1xf32>,
    } else {
    }
    return
  }
  func.func @transform_0(%arg0: i32, %arg1: i32) -> i32 {
    %c0_i32 = arith.constant 0 : i32
    %c0_i32_0 = arith.constant 0 : i32
    return %c0_i32 : i32
  }
  func.func @transform_1(%arg0: i32, %arg1: i32) -> (i32, i32) {
    %c0_i32 = arith.constant 0 : i32
    return %arg0, %arg1 : i32, i32
  }
  func.func @transform_2(%arg0: i32, %arg1: i32) -> (i32, i32) {
    %c0_i32 = arith.constant 0 : i32
    %c0_i32_0 = arith.constant 0 : i32
    return %arg0, %c0_i32 : i32, i32
  }
}

</mosaic_0001>

<bundles_post_ra>
// kernel: tpu_custom_call.1
= control target key start
LH: loop header
LB: loop body
LE: loop exit
PB: predicated region body
PF: predicated region fallthrough
CT: control target
= control target key end

     0   :  { %s609_s0 = inlined_call_operand.<no memory space> [shape: f32[1], index: 0, kind: input, shape index: {}]   ;;  %s610_s1 = inlined_call_operand.hbm [shape: f32[16,128], index: 1, kind: input, shape index: {}]   ;;  %s611_s2 = inlined_call_operand.vmem [shape: f32[16,1], index: 2, kind: output, shape index: {}]  }
   0x1   :  { %7 = sst [smem:[#allocation4]] %s609_s0 }
   0x2   :  { %8 = vsyncpa [#allocation6], 0 }
   0x3   :  { %10 = vsyncpa [#allocation6 + $0x1], 0  ;;  %s479_s11 = smov 0   ;;  %s481_s12 = smov 0  }
   0x4   :  { %s483_s13 = smov 0   ;;  %s485_s14 = smov 0  }
   0x5   :  { %s487_s15 = smov 0   ;;  %s489_s16 = smov 0  }
   0x6 LB: > { %s295_s0 = sadd.s32 4294967295, %s455_s16   ;;  %s28_s17 = sadd.s32 1, %s451_s15  ;;  %s455_s16 = sphi %s489_s16, %s16_s16   ;;  %s451_s15 = sphi %s487_s15, %s621_s15   ;;  %s447_s14 = sphi %s485_s14, %s620_s14   ;;  %s443_s13 = sphi %s483_s13, %s619_s13   ;;  %s439_s12 = sphi %s481_s12, %s618_s12   ;;  %s435_s11 = sphi %s479_s11, %s617_s11  }
   0x7   : > { %p30_p0 = scmp.ge.s32.totalorder %s28_s17, 2  ;;  %s58_s18 = sadd.s32 1, %s443_s13 }
   0x8   : > { %p65_p1 = scmp.ne.s32.totalorder %s443_s13, %s439_s12  ;;  %p66_p2 = scmp.eq.s32.totalorder %s455_s16, 0 }
   0x9   : > { %s623_s17 = smov (%p30_p0, %s28_s17), 0  ;;  %p71_p4 = scmp.ne.s32.totalorder %s439_s12, %s435_s11 }
   0xa   : > { %p515_p3 = por %p66_p2, %p65_p1  ;;  %s53_s20 = ssub.s32 %s451_s15, %s623_s17 }
   0xb   : > { %p72_p5 = scmp.eq.s32.totalorder %s295_s0, 0  ;;  %p56_p6 = scmp.eq.s32.totalorder %s53_s20, 0 }
   0xc   : > { %p314_p8 = scmp.lt.s32.totalorder %s455_s16, 2  ;;  %s124_s23 = sand.u32 1, %s443_s13  }
   0xd   : > { %p522_p7 = por %p72_p5, %p71_p4  ;;  %s300_s24 = sshll.u32 %s451_s15, 7 }
   0xe   : > { %s528_s22 = scalar_select %p56_p6, %s443_s13, %s58_s18  }
   0xf   : > { %s299_s25 = sshll.u32 %s124_s23, 3  ;;  %s535_s28 = scalar_lea.hbm %s610_s1, %s300_s24 }
  0x10   : > { %s128_s29 = scalar_lea.vmem [#allocation5], %s299_s25  ;;  %p539_p9 = pnand %p314_p8, %p515_p3 }
  0x11   : > { %s136_s30 = sshll.u32 %s128_s29, 4  ;;  %s125_s4 = scalar_lea.sflag [#allocation6], %s124_s23  ;;  %s543_s30 = int_to_ptr.vmem [resolvable:$true] %s136_s30 }
  0x12   : > { %s375_s5 = scalar_lea.hbm %s535_s28, 128  ;;  %p377_p13 = pneg %p539_p9 }
  0x13   : > { %p376_p12 = scmp.ne.s32.totalorder %s535_s28, %s375_s5  ;;  %s380_s8 = scalar_lea.hbm %s610_s1, 256 }
  0x14   : > { %p381_p2 = scmp.lt.u32.totalorder %s535_s28, %s610_s1  ;;  %p382_p3 = scmp.lt.u32.totalorder %s380_s8, %s375_s5 }
  0x15   : > { %p378_p0 = pnand %p377_p13, %p376_p12  ;;  %p384_p5 = scmp.lt.u32.totalorder %s375_s5, %s535_s28 }
  0x16   : > { %p383_p4 = por %p382_p3, %p381_p2 }
  0x17   : > { %p379_p1 = pneg %p378_p0 }
  0x18   : > { %p385_p6 = por %p384_p5, %p383_p4 }
  0x1a   : > { %p386_p8 = pnand %p385_p6, %p379_p1 }
  0x1c   : > { %389 = shalt.err (!%p386_p8)
}
  0x1d   : > { %s390_s11 = scalar_lea.vmem %s543_s30, 128  ;;  %s457_s0 = smov [#allocation5]  }
  0x1e   : > { %p391_p12 = scmp.ne.s32.totalorder %s543_s30, %s390_s11  ;;  %s395_s18 = sshll.u32 %s457_s0, 4  ;;  %s396_s18 = int_to_ptr.vmem [resolvable:$false] %s395_s18 }
  0x1f   : > { %s397_s19 = scalar_lea.vmem %s396_s18, 256  ;;  %p398_p11 = scmp.lt.s32.totalorder %s543_s30, %s396_s18 }
  0x20   : > { %p393_p0 = pnand %p391_p12, %p377_p13  ;;  %p399_p2 = scmp.lt.s32.totalorder %s397_s19, %s390_s11 }
  0x22   : > { %p394_p10 = pneg %p393_p0  ;;  %p400_p3 = por %p399_p2, %p398_p11 }
  0x24   : > { %p401_p4 = pnand %p400_p3, %p394_p10 }
  0x26   : > { %404 = shalt.err (!%p401_p4)
}
  0x27   : > { %313 = dma.hbm_to_vmem [thread:$0]  (!%p539_p9), %s535_s28, 128, %s543_s30, %s125_s4  }
  0x28   : > { %p615_p1 = scmp.lt.s32.totalorder %s455_s16, 3  ;;  %p616_p5 = scmp.ge.s32.totalorder %s455_s16, 1 }
  0x2a   : > { %p142_p13 = pnand %p616_p5, %p615_p1 }
  0x2b   : > { %s147_s20 = sand.u32 (!%p142_p13), 1, %s439_s12  }
  0x2c   : > { %145 = sbr.rel (%p142_p13) target bundleno = 578 (0x242), region = 28  ;;  %s302_s23 = sshll.u32 (!%p142_p13), %s147_s20, 3 }
  0x2d   : > { %s148_s24 = scalar_lea.sflag (!%p142_p13), [#allocation6], %s147_s20  ;;  %s151_s25 = scalar_lea.vmem (!%p142_p13), [#allocation5], %s302_s23 }
  0x33   : > { %430 = dma.done.wait (%p522_p7), %s148_s24, 128  }
  0x34   : > { %432 = vsyncadd (%p522_p7), %s148_s24, 4294967168  ;;  %vm179_vm0 = vcmask 7168   ;;  %s182_s26 = sld [smem:[#allocation4]]  ;;  %v458_v0 = vmov -1e+30   ;;  %v188_v3 = vld [vmem:[%s151_s25] sm:$0xff] }
  0x35   : > { %180 = vst.msk [vmem:[#allocation2] sm:$0xff] %vm179_vm0, %v458_v0  ;;  %v459_v6 = vmov 0   ;;  %v460_v7 = vmov 0.0   ;;  %p171_p7 = scmp.lt.s32.totalorder %s447_s14, 1 }
  0x36   : > { %366 = vset.pattern.permute.xlu0 %v459_v6  ;;  %181 = vst.msk [vmem:[#allocation3] sm:$0xff] %vm179_vm0, %v460_v7 }
  0x37   : > { %s625_s14 = smov (!%p171_p7, %s447_s14), 1 }
  0x38   : > { %s303_s21 = sshll.u32 %s625_s14, 3 }
  0x39   : > { %s174_s30 = scalar_lea.vmem %s611_s2, %s303_s21 }
  0x3a   : > { %v183_v1 = vstv %s182_s26 }
  0x3b   : > { %367 = vrcp.f32 %v183_v1 }
  0x3c   : > { %v186_v8 = vld [vmem:[#allocation2] sm:$0xff] }
  0x3d   : > { %v187_v18 = vld [vmem:[#allocation3] sm:$0xff] }
  0x45   : > { %v368_v2 = vpop.eup %367 }
  0x46   : > { %306 = vpush %v368_v2 }
  0x77   : > { %s307_s27 = spop %306 }
  0x78   : > { %v189_v4 = vstv %s307_s27 }
  0x79   : > { %v190_v5 = vmul.f32 %v189_v4, %v188_v3 }
  0x7b   : > { %191 = vmax.xlane.f32.xlu0 %v190_v5 }
 0x108   : > { %v192_v9 = vpop.xlane.xlu0 %191 }
 0x109   : > { %v193_v10 = vmax.f32 %v186_v8, %v192_v9 }
 0x10b   : > { %v194_v11 = vsub.f32 %v186_v8, %v193_v10  ;;  %210 = vst.msk [vmem:[#allocation2] sm:$0xff] %vm179_vm0, %v193_v10  ;;  %200 = vperm.xlu0 %366, %v193_v10  }
 0x10d   : > { %v195_v16 = vmul.f32 1.442695, %v194_v11 }
 0x112   : > { %v215_v25 = vld [vmem:[#allocation2] sm:$0xff] }
 0x18a   : > { %v201_v12 = vpop.permute.xlu0 %200 }
 0x18b   : > { %v203_v13 = vsub.f32 %v190_v5, %v201_v12 }
 0x18d   : > { %v204_v14 = vmul.f32 1.442695, %v203_v13 }
 0x18f   : > { %369 = vpow2.f32 %v204_v14 }
 0x190   : > { %371 = vpow2.f32 %v195_v16 }
 0x199   : > { %v370_v15 = vpop.eup %369 }
 0x19a   : > { %206 = vadd.xlane.f32.xlu1 %v370_v15  ;;  %v372_v17 = vpop.eup %371 }
 0x19b   : > { %v197_v19 = vmul.f32 %v372_v17, %v187_v18 }
 0x227   : > { %v207_v20 = vpop.xlane.xlu1 %206 }
 0x228   : > { %v208_v21 = vadd.f32 %v207_v20, %v197_v19 }
 0x22a   : > { %211 = vst.msk [vmem:[#allocation3] sm:$0xff] %vm179_vm0, %v208_v21 }
 0x231   : > { %v216_v22 = vld [vmem:[#allocation3] sm:$0xff] }
 0x232   : > { %373 = vlog2.f32 %v216_v22 }
 0x23c   : > { %v374_v23 = vpop.eup %373 }
 0x23d   : > { %v218_v24 = vmul.f32 0.6931472, %v374_v23 }
 0x23f   : > { %v219_v26 = vadd.f32 %v218_v24, %v215_v25 }
 0x241   : > { %220 = vst.msk [vmem:[%s174_s30] sm:$0xff] %vm179_vm0, %v219_v26 }
 0x242 PF: > { %s16_s16 = sadd.s32 1, %s455_s16   ;;  %s617_s11 = smov %s439_s12 }
 0x243   : > { %p13_p9 = scmp.ge.s32.totalorder %s16_s16, 4   ;;  %s618_s12 = smov %s443_s13 }
 0x244   : > { %s619_s13 = smov %s528_s22  ;;  %s620_s14 = smov %s451_s15 }
 0x245   : > { %s621_s15 = smov %s623_s17  ;;  %15 = sbr.rel (!%p13_p9) target bundleno = 6 (0x6), region = 76 }
 0x24c   :  { %240 = vsyncpa [#allocation6], 1 }
 0x24d   :  { %242 = vsyncpa [#allocation6 + $0x1], 1 }

</bundles_post_ra>
